<compile_context>
chip_gen: v7x
topology: tpu7x:2x2x1
jax: 0.10.0
libtpu: 0.0.40
codegen_flags: <defaults>
</compile_context>

<pallas_src>
import functools

import jax
import jax.numpy as jnp
from jax.experimental import pallas as pl
from jax.experimental.pallas import tpu as pltpu

_LANE = 128
_SUBLANE = 8


def _round_up(x, m):
    return (x + m - 1) // m * m


def _dualq_kernel(n_trunk, out_dim, *refs):
    """refs = [x, (W, b) * n_trunk, W_heads, b_heads, out]."""
    x_ref = refs[0]
    idx = 1
    h = x_ref[...]  # f32 (TB, in_pad)

    # Trunk: Linear + Tanh, statically unrolled. Weights may be bf16 (MXU operands only);
    # bias add + tanh stay f32 (v5e VPU/EUP have no bf16).
    for _ in range(n_trunk):
        w_ref, b_ref = refs[idx], refs[idx + 1]
        idx += 2
        acc = jnp.dot(h.astype(w_ref.dtype), w_ref[...],
                      preferred_element_type=jnp.float32)
        h = jnp.tanh(acc + b_ref[...])

    wh_ref, bh_ref, out_ref = refs[idx], refs[idx + 1], refs[idx + 2]

    # Fused dueling heads: columns [0, out_dim) = advantage, column out_dim = value,
    # remaining lanes are zero padding (never stored).
    heads = jnp.dot(h.astype(wh_ref.dtype), wh_ref[...],
                    preferred_element_type=jnp.float32) + bh_ref[...]

    a = heads[:, :out_dim]                       # advantage columns (static slice)
    v = heads[:, out_dim:out_dim + 1]            # value column (static slice, no mask reduce)
    a_mean = jnp.sum(a, axis=1, keepdims=True) * (1.0 / out_dim)

    # Single fused correction, narrow (TB, out_dim) store.
    out_ref[...] = a + (v - a_mean)


def prepare_dualq_params(params, *, weight_dtype=jnp.bfloat16):
    """Pad / dtype-convert parameters ONCE (outside the hot path).

    params = (trunk_weights, trunk_biases, wv, bv, wa, ba); weights are (fan_in, fan_out).
    Returns a pytree consumed by dualq_forward.
    """
    trunk_w, trunk_b, wv, bv, wa, ba = params
    n_unit, out_dim = wa.shape
    in_dim = trunk_w[0].shape[0]

    in_pad = _round_up(in_dim, _SUBLANE)           # sublane-aligned only; x stays narrow
    h_pad = _round_up(n_unit, _LANE)
    head_pad = _round_up(out_dim + 1, _LANE)       # advantage cols + value col, lane-padded

    trunk = []
    fan_in_pads = [in_pad] + [h_pad] * (len(trunk_w) - 1)
    for w, b, fi_pad in zip(trunk_w, trunk_b, fan_in_pads):
        fi, fo = w.shape
        w_p = jnp.zeros((fi_pad, h_pad), weight_dtype).at[:fi, :fo].set(w.astype(weight_dtype))
        b_p = jnp.zeros((1, h_pad), jnp.float32).at[:, :fo].set(jnp.reshape(b, (1, -1)))
        trunk.append((w_p, b_p))

    # Fused dueling heads: [a_head | v_head], lane-padded.
    w_heads = jnp.zeros((h_pad, head_pad), weight_dtype)
    w_heads = w_heads.at[:n_unit, :out_dim].set(wa.astype(weight_dtype))
    w_heads = w_heads.at[:n_unit, out_dim:out_dim + 1].set(wv.astype(weight_dtype))
    b_heads = jnp.zeros((1, head_pad), jnp.float32)
    b_heads = b_heads.at[:, :out_dim].set(jnp.reshape(ba, (1, -1)))
    b_heads = b_heads.at[:, out_dim:out_dim + 1].set(jnp.reshape(bv, (1, -1)))

    return {
        "trunk": tuple(trunk),
        "w_heads": w_heads,
        "b_heads": b_heads,
        "in_dim": int(in_dim),
        "out_dim": int(out_dim),
    }


def dualq_forward(x, padded_params, *, block_b=1024):
    """Forward pass. `padded_params` comes from prepare_dualq_params (call it once)."""
    trunk = padded_params["trunk"]
    w_heads = padded_params["w_heads"]
    b_heads = padded_params["b_heads"]
    out_dim = padded_params["out_dim"]
    n_trunk = len(trunk)

    B, in_dim = x.shape
    in_pad = trunk[0][0].shape[0]
    h_pad = trunk[0][0].shape[1]
    head_pad = w_heads.shape[1]

    # Batch tiling: tiles of <= block_b rows chosen to minimize padding; keep >= 2 grid
    # steps whenever B > 8 so the "parallel" axis spans both v7x TensorCores.
    n_steps = max(pl.cdiv(B, block_b), 2 if B > _SUBLANE else 1)
    TB = _round_up(pl.cdiv(B, n_steps), _SUBLANE)
    grid_steps = pl.cdiv(B, TB)
    B_pad = grid_steps * TB

    x = x.astype(jnp.float32)
    if B_pad != B or in_pad != in_dim:
        # Zero padding is exact: tanh(0)=0 contributions vanish, padded weight rows are 0,
        # padded batch rows are discarded below.
        x_p = jnp.zeros((B_pad, in_pad), jnp.float32).at[:B, :in_dim].set(x)
    else:
        x_p = x

    resident = pl.Buffered(1)  # constant-index weights: single VMEM buffer, stays resident

    flat_inputs = [x_p]
    in_specs = [pl.BlockSpec((TB, in_pad), lambda i: (i, 0))]
    for w_p, b_p in trunk:
        flat_inputs += [w_p, b_p]
        in_specs += [pl.BlockSpec(w_p.shape, lambda i: (0, 0), pipeline_mode=resident),
                     pl.BlockSpec(b_p.shape, lambda i: (0, 0), pipeline_mode=resident)]
    flat_inputs += [w_heads, b_heads]
    in_specs += [pl.BlockSpec(w_heads.shape, lambda i: (0, 0), pipeline_mode=resident),
                 pl.BlockSpec(b_heads.shape, lambda i: (0, 0), pipeline_mode=resident)]

    out_spec = pl.BlockSpec((TB, out_dim), lambda i: (i, 0))

    # Honest VMEM budget: single-buffered params + double-buffered x/out tiles + headroom,
    # capped at v7x's 64 MiB physical VMEM.
    param_bytes = sum(int(a.size) * a.dtype.itemsize for a in flat_inputs[1:])
    io_bytes = 2 * TB * in_pad * 4 + 2 * TB * out_dim * 4
    vmem_limit = int(min(64 << 20, max(8 << 20, param_bytes + io_bytes + (2 << 20))))

    cost = pl.CostEstimate(
        flops=2 * B_pad * (in_pad * h_pad + (n_trunk - 1) * h_pad * h_pad + h_pad * head_pad),
        transcendentals=B_pad * n_trunk * h_pad,
        bytes_accessed=int(x_p.size * 4 + B_pad * out_dim * 4 + param_bytes),
    )

    kernel = functools.partial(_dualq_kernel, n_trunk, out_dim)

    out = pl.pallas_call(
        kernel,
        out_shape=jax.ShapeDtypeStruct((B_pad, out_dim), jnp.float32),
        grid=(grid_steps,),
        in_specs=in_specs,
        out_specs=out_spec,
        compiler_params=pltpu.CompilerParams(
            dimension_semantics=("parallel",),
            vmem_limit_bytes=vmem_limit,
        ),
        cost_estimate=cost,
    )(*flat_inputs)

    return out if B_pad == B else out[:B]


def init_dualq_params(key, inputs_dim, outputs_dim, n_layer, n_unit):
    """Deterministic init mimicking torch.nn.Linear default (uniform +/- 1/sqrt(fan_in))."""
    def linear_init(k, fan_in, fan_out):
        kw, kb = jax.random.split(k)
        bound = 1.0 / jnp.sqrt(jnp.float32(fan_in))
        w = jax.random.uniform(kw, (fan_in, fan_out), jnp.float32, -bound, bound)
        b = jax.random.uniform(kb, (1, fan_out), jnp.float32, -bound, bound)
        return w, b

    dims = [inputs_dim] + [n_unit] * (n_layer - 1)
    keys = jax.random.split(key, len(dims) + 1)
    trunk_w, trunk_b = [], []
    for i in range(len(dims) - 1):
        w, b = linear_init(keys[i], dims[i], dims[i + 1])
        trunk_w.append(w)
        trunk_b.append(b)
    kv, ka = jax.random.split(keys[-1])
    wv, bv = linear_init(kv, n_unit, 1)
    wa, ba = linear_init(ka, n_unit, outputs_dim)
    return trunk_w, trunk_b, wv, bv, wa, ba


def dualq_reference(x, params):
    """Pure-JAX reference matching the PyTorch forward."""
    trunk_w, trunk_b, wv, bv, wa, ba = params
    h = x
    for w, b in zip(trunk_w, trunk_b):
        h = jnp.tanh(h @ w + b)
    v = h @ wv + bv
    a = h @ wa + ba
    return v + a - jnp.mean(a, axis=1, keepdims=True)


if __name__ == "__main__":
    # Small, module-consistent shapes.
    batch = 8
    inputs_dim = 16     # observation dim
    outputs_dim = 4     # discrete action count
    n_layer = 3         # Linear(in,n_unit)+Tanh, Linear(n_unit,n_unit)+Tanh, then dueling heads
    n_unit = 32

    key = jax.random.PRNGKey(0)
    k_x, k_p = jax.random.split(key)
    x = jax.random.normal(k_x, (batch, inputs_dim), jnp.float32)
    params = init_dualq_params(k_p, inputs_dim, outputs_dim, n_layer, n_unit)
    ref = dualq_reference(x, params)

    # f32 weights: exact correctness check against the pure-JAX reference.
    padded_f32 = prepare_dualq_params(params, weight_dtype=jnp.float32)
    out = jax.block_until_ready(dualq_forward(x, padded_f32))
    assert out.shape == (batch, outputs_dim)
    assert jnp.allclose(out, ref, atol=1e-5, rtol=1e-5), "f32 mismatch vs reference"

    # bf16 weights (default): MXU-operand quantization only, elementwise math stays f32.
    padded_bf16 = prepare_dualq_params(params)
    out_bf16 = jax.block_until_ready(dualq_forward(x, padded_bf16))
    assert out_bf16.shape == (batch, outputs_dim)
    assert bool(jnp.all(jnp.isfinite(out_bf16)))
    assert jnp.allclose(out_bf16, ref, atol=5e-2, rtol=5e-2), "bf16 mismatch vs reference"

    # Larger, non-tile-aligned batch: exercises multi-step grid + batch padding path.
    x_big = jax.random.normal(jax.random.PRNGKey(1), (300, inputs_dim), jnp.float32)
    out_big = jax.block_until_ready(dualq_forward(x_big, padded_f32))
    assert out_big.shape == (300, outputs_dim)
    assert jnp.allclose(out_big, dualq_reference(x_big, params), atol=1e-5, rtol=1e-5), \
        "large-batch mismatch vs reference"

    print("KERNEL_OK")
</pallas_src>

<mosaic_0001>
module attributes {stable_mosaic.version = 11 : i64} {
  func.func @_dualq_kernel(%arg0: i32, %arg1: memref<8x16xf32, #tpu.memory_space<vmem>>, %arg2: memref<16x128xf32, #tpu.memory_space<vmem>>, %arg3: memref<1x128xf32, #tpu.memory_space<vmem>>, %arg4: memref<128x128xf32, #tpu.memory_space<vmem>>, %arg5: memref<1x128xf32, #tpu.memory_space<vmem>>, %arg6: memref<128x128xf32, #tpu.memory_space<vmem>>, %arg7: memref<1x128xf32, #tpu.memory_space<vmem>>, %arg8: memref<8x4xf32, #tpu.memory_space<vmem>>) attributes {dimension_semantics = [#tpu.dimension_semantics<parallel>], iteration_bounds = array<i64: 1>, scalar_prefetch = 0 : i64, scratch_operands = 0 : i64, tpu.core_type = #tpu.core_type<tc>, window_params = [{transform_indices = @transform_0, window_bounds = array<i64: 8, 16>}, {pipeline_mode = #tpu.pipeline_mode<synchronous>, transform_indices = @transform_1, window_bounds = array<i64: 16, 128>}, {pipeline_mode = #tpu.pipeline_mode<synchronous>, transform_indices = @transform_2, window_bounds = array<i64: 1, 128>}, {pipeline_mode = #tpu.pipeline_mode<synchronous>, transform_indices = @transform_3, window_bounds = array<i64: 128, 128>}, {pipeline_mode = #tpu.pipeline_mode<synchronous>, transform_indices = @transform_4, window_bounds = array<i64: 1, 128>}, {pipeline_mode = #tpu.pipeline_mode<synchronous>, transform_indices = @transform_5, window_bounds = array<i64: 128, 128>}, {pipeline_mode = #tpu.pipeline_mode<synchronous>, transform_indices = @transform_6, window_bounds = array<i64: 1, 128>}, {transform_indices = @transform_7, window_bounds = array<i64: 8, 4>}]} {
    %c0 = arith.constant 0 : index
    %c0_0 = arith.constant 0 : index
    %0 = vector.load %arg1[%c0, %c0_0] : memref<8x16xf32, #tpu.memory_space<vmem>>, vector<8x16xf32>
    %c0_1 = arith.constant 0 : index
    %c0_2 = arith.constant 0 : index
    %1 = vector.load %arg2[%c0_1, %c0_2] : memref<16x128xf32, #tpu.memory_space<vmem>>, vector<16x128xf32>
    %cst = arith.constant dense<0.000000e+00> : vector<8x128xf32>
    %2 = tpu.matmul %0, %1, %cst {dimension_numbers = #tpu.dot_dimension_numbers<[1], [0], [0], [1], [0, 0, 1, 1], [], []>} : vector<8x16xf32>, vector<16x128xf32>, vector<8x128xf32> -> vector<8x128xf32>
    %c0_3 = arith.constant 0 : index
    %c0_4 = arith.constant 0 : index
    %3 = vector.load %arg3[%c0_3, %c0_4] : memref<1x128xf32, #tpu.memory_space<vmem>>, vector<1x128xf32>
    %4 = vector.broadcast %3 : vector<1x128xf32> to vector<8x128xf32>
    %5 = arith.addf %2, %4 : vector<8x128xf32>
    %6 = math.tanh %5 : vector<8x128xf32>
    %c0_5 = arith.constant 0 : index
    %c0_6 = arith.constant 0 : index
    %7 = vector.load %arg4[%c0_5, %c0_6] : memref<128x128xf32, #tpu.memory_space<vmem>>, vector<128x128xf32>
    %cst_7 = arith.constant dense<0.000000e+00> : vector<8x128xf32>
    %8 = tpu.matmul %6, %7, %cst_7 {dimension_numbers = #tpu.dot_dimension_numbers<[1], [0], [0], [1], [0, 0, 1, 1], [], []>} : vector<8x128xf32>, vector<128x128xf32>, vector<8x128xf32> -> vector<8x128xf32>
    %c0_8 = arith.constant 0 : index
    %c0_9 = arith.constant 0 : index
    %9 = vector.load %arg5[%c0_8, %c0_9] : memref<1x128xf32, #tpu.memory_space<vmem>>, vector<1x128xf32>
    %10 = vector.broadcast %9 : vector<1x128xf32> to vector<8x128xf32>
    %11 = arith.addf %8, %10 : vector<8x128xf32>
    %12 = math.tanh %11 : vector<8x128xf32>
    %c0_10 = arith.constant 0 : index
    %c0_11 = arith.constant 0 : index
    %13 = vector.load %arg6[%c0_10, %c0_11] : memref<128x128xf32, #tpu.memory_space<vmem>>, vector<128x128xf32>
    %cst_12 = arith.constant dense<0.000000e+00> : vector<8x128xf32>
    %14 = tpu.matmul %12, %13, %cst_12 {dimension_numbers = #tpu.dot_dimension_numbers<[1], [0], [0], [1], [0, 0, 1, 1], [], []>} : vector<8x128xf32>, vector<128x128xf32>, vector<8x128xf32> -> vector<8x128xf32>
    %c0_13 = arith.constant 0 : index
    %c0_14 = arith.constant 0 : index
    %15 = vector.load %arg7[%c0_13, %c0_14] : memref<1x128xf32, #tpu.memory_space<vmem>>, vector<1x128xf32>
    %16 = vector.broadcast %15 : vector<1x128xf32> to vector<8x128xf32>
    %17 = arith.addf %14, %16 : vector<8x128xf32>
    %18 = vector.extract_strided_slice %17 {offsets = [0, 0], sizes = [8, 4], strides = [1, 1]} : vector<8x128xf32> to vector<8x4xf32>
    %19 = vector.extract_strided_slice %17 {offsets = [0, 4], sizes = [8, 1], strides = [1, 1]} : vector<8x128xf32> to vector<8x1xf32>
    %cst_15 = arith.constant dense<0.000000e+00> : vector<8xf32>
    %20 = vector.multi_reduction <add>, %18, %cst_15 [1] : vector<8x4xf32> to vector<8xf32>
    %21 = vector.shape_cast %20 : vector<8xf32> to vector<8x1xf32>
    %cst_16 = arith.constant 2.500000e-01 : f32
    %22 = vector.broadcast %cst_16 : f32 to vector<8x1xf32>
    %23 = arith.mulf %21, %22 : vector<8x1xf32>
    %24 = arith.subf %19, %23 : vector<8x1xf32>
    %25 = vector.broadcast %24 : vector<8x1xf32> to vector<8x4xf32>
    %26 = arith.addf %18, %25 : vector<8x4xf32>
    %c0_17 = arith.constant 0 : index
    %c0_18 = arith.constant 0 : index
    %27 = vector.load %arg8[%c0_17, %c0_18] : memref<8x4xf32, #tpu.memory_space<vmem>>, vector<8x4xf32>
    tpu.vector_store %arg8[%c0_17, %c0_18], %26 {strides = array<i32>} : memref<8x4xf32, #tpu.memory_space<vmem>>, vector<8x4xf32>,
    return
  }
  func.func @transform_0(%arg0: i32) -> (i32, i32) {
    %c0_i32 = arith.constant 0 : i32
    %c0_i32_0 = arith.constant 0 : i32
    return %arg0, %c0_i32 : i32, i32
  }
  func.func @transform_1(%arg0: i32) -> (i32, i32) {
    %c0_i32 = arith.constant 0 : i32
    %c0_i32_0 = arith.constant 0 : i32
    %c0_i32_1 = arith.constant 0 : i32
    return %c0_i32, %c0_i32_0 : i32, i32
  }
  func.func @transform_2(%arg0: i32) -> (i32, i32) {
    %c0_i32 = arith.constant 0 : i32
    %c0_i32_0 = arith.constant 0 : i32
    %c0_i32_1 = arith.constant 0 : i32
    return %c0_i32, %c0_i32_0 : i32, i32
  }
  func.func @transform_3(%arg0: i32) -> (i32, i32) {
    %c0_i32 = arith.constant 0 : i32
    %c0_i32_0 = arith.constant 0 : i32
    %c0_i32_1 = arith.constant 0 : i32
    return %c0_i32, %c0_i32_0 : i32, i32
  }
  func.func @transform_4(%arg0: i32) -> (i32, i32) {
    %c0_i32 = arith.constant 0 : i32
    %c0_i32_0 = arith.constant 0 : i32
    %c0_i32_1 = arith.constant 0 : i32
    return %c0_i32, %c0_i32_0 : i32, i32
  }
  func.func @transform_5(%arg0: i32) -> (i32, i32) {
    %c0_i32 = arith.constant 0 : i32
    %c0_i32_0 = arith.constant 0 : i32
    %c0_i32_1 = arith.constant 0 : i32
    return %c0_i32, %c0_i32_0 : i32, i32
  }
  func.func @transform_6(%arg0: i32) -> (i32, i32) {
    %c0_i32 = arith.constant 0 : i32
    %c0_i32_0 = arith.constant 0 : i32
    %c0_i32_1 = arith.constant 0 : i32
    return %c0_i32, %c0_i32_0 : i32, i32
  }
  func.func @transform_7(%arg0: i32) -> (i32, i32) {
    %c0_i32 = arith.constant 0 : i32
    %c0_i32_0 = arith.constant 0 : i32
    return %arg0, %c0_i32 : i32, i32
  }
}

</mosaic_0001>

<bundles_post_ra>
// kernel: tpu_custom_call.1
= control target key start
LH: loop header
LB: loop body
LE: loop exit
PB: predicated region body
PF: predicated region fallthrough
CT: control target
= control target key end

     0   :  { %12 = vsyncpa [#allocation3], 0  ;;  %s788_s0 = inlined_call_operand.hbm [shape: f32[8,16], index: 0, kind: input, shape index: {}]   ;;  %s789_s1 = inlined_call_operand.hbm [shape: f32[16,128], index: 1, kind: input, shape index: {}]   ;;  %s790_s2 = inlined_call_operand.vmem [shape: f32[1,128], index: 2, kind: input, shape index: {}]   ;;  %s791_s3 = inlined_call_operand.hbm [shape: f32[128,128], index: 3, kind: input, shape index: {}]   ;;  %s792_s4 = inlined_call_operand.vmem [shape: f32[1,128], index: 4, kind: input, shape index: {}]   ;;  %s793_s5 = inlined_call_operand.hbm [shape: f32[128,128], index: 5, kind: input, shape index: {}]   ;;  %s794_s6 = inlined_call_operand.vmem [shape: f32[1,128], index: 6, kind: input, shape index: {}]   ;;  %s795_s7 = inlined_call_operand.vmem [shape: f32[8,4], index: 7, kind: output, shape index: {}]  }
   0x1   :  { %13 = vsyncpa [#allocation5], 0 }
   0x2   :  { %14 = vsyncpa [#allocation8], 0  ;;  %s649_s24 = smov [#allocation4]   ;;  %s555_s28 = scalar_lea.hbm %s789_s1, 256 }
   0x3   :  { %s30_s25 = sshll.u32 %s649_s24, 4  ;;  %p556_p0 = scmp.ne.s32.totalorder %s789_s1, %s555_s28  ;;  %s31_s25 = int_to_ptr.vmem [resolvable:$true] %s30_s25 }
   0x4   :  { %p559_p1 = scmp.lt.u32.totalorder %s555_s28, %s789_s1 }
   0x6   :  { %p561_p2 = pnand %p559_p1, %p556_p0 }
   0x8   :  { %564 = shalt.err (!%p561_p2)
}
   0x9   :  { %s565_s10 = scalar_lea.vmem %s31_s25, 256  ;;  %p570_p4 = scmp.lt.s32.totalorder %s31_s25, %s31_s25 }
   0xa   :  { %p566_p3 = scmp.ne.s32.totalorder %s31_s25, %s565_s10  ;;  %p571_p5 = scmp.lt.s32.totalorder %s565_s10, %s565_s10 }
   0xc   :  { %p572_p6 = por %p571_p5, %p570_p4 }
   0xe   :  { %p573_p7 = pnand %p572_p6, %p566_p3 }
  0x10   :  { %576 = shalt.err (!%p573_p7)
}
  0x11   :  { %s650_s11 = smov 128   ;;  %s651_s12 = smov 8  }
  0x12   :  { %36 = dma.hbm_to_vmem [thread:$0]  %s789_s1, 256, %s31_s25, [#allocation5], %s650_s11, %s650_s11, %s651_s12  }
  0x13   :  { %s652_s15 = smov [#allocation2]   ;;  %s653_s17 = smov [#allocation6]  }
  0x14   :  { %s21_s16 = sshll.u32 %s652_s15, 4  ;;  %s44_s18 = sshll.u32 %s653_s17, 4  ;;  %s22_s16 = int_to_ptr.vmem [resolvable:$true] %s21_s16  ;;  %s45_s18 = int_to_ptr.vmem [resolvable:$true] %s44_s18 }
  0x15   :  { %s577_s21 = scalar_lea.hbm %s788_s0, 128 }
  0x16   :  { %p578_p8 = scmp.ne.s32.totalorder %s788_s0, %s577_s21  ;;  %p581_p9 = scmp.lt.u32.totalorder %s577_s21, %s788_s0 }
  0x18   :  { %p583_p10 = pnand %p581_p9, %p578_p8 }
  0x1a   :  { %586 = shalt.err (!%p583_p10)
}
  0x1b   :  { %s587_s1 = scalar_lea.vmem %s22_s16, 128  ;;  %p592_p12 = scmp.lt.s32.totalorder %s22_s16, %s22_s16 }
  0x1c   :  { %p588_p11 = scmp.ne.s32.totalorder %s22_s16, %s587_s1  ;;  %p593_p13 = scmp.lt.s32.totalorder %s587_s1, %s587_s1 }
  0x1e   :  { %p594_p0 = por %p593_p13, %p592_p12 }
  0x20   :  { %p595_p1 = pnand %p594_p0, %p588_p11 }
  0x22   :  { %598 = shalt.err (!%p595_p1)
}
  0x23   :  { %24 = dma.hbm_to_vmem [thread:$0]  %s788_s0, 128, %s22_s16, [#allocation3]  }
  0x24   :  { %s599_s30 = scalar_lea.hbm %s791_s3, 2048 }
  0x25   :  { %p600_p2 = scmp.ne.s32.totalorder %s791_s3, %s599_s30  ;;  %p603_p3 = scmp.lt.u32.totalorder %s599_s30, %s791_s3 }
  0x27   :  { %p605_p4 = pnand %p603_p3, %p600_p2 }
  0x29   :  { %608 = shalt.err (!%p605_p4)
}
  0x2a   :  { %s609_s14 = scalar_lea.vmem %s45_s18, 2048  ;;  %p614_p6 = scmp.lt.s32.totalorder %s45_s18, %s45_s18 }
  0x2b   :  { %p610_p5 = scmp.ne.s32.totalorder %s45_s18, %s609_s14  ;;  %p615_p7 = scmp.lt.s32.totalorder %s609_s14, %s609_s14 }
  0x2d   :  { %p616_p8 = por %p615_p7, %p614_p6 }
  0x2f   :  { %p617_p9 = pnand %p616_p8, %p610_p5 }
  0x31   :  { %620 = shalt.err (!%p617_p9)
}
  0x32   :  { %50 = dma.hbm_to_vmem [thread:$0]  %s791_s3, 2048, %s45_s18, [#allocation5], %s650_s11, %s650_s11, %s651_s12  }
  0x33   :  { %s654_s16 = smov [#allocation7]   ;;  %s621_s21 = scalar_lea.hbm %s793_s5, 2048 }
  0x34   :  { %s58_s17 = sshll.u32 %s654_s16, 4  ;;  %p622_p10 = scmp.ne.s32.totalorder %s793_s5, %s621_s21  ;;  %s59_s17 = int_to_ptr.vmem [resolvable:$true] %s58_s17 }
  0x35   :  { %p625_p11 = scmp.lt.u32.totalorder %s621_s21, %s793_s5 }
  0x37   :  { %p627_p12 = pnand %p625_p11, %p622_p10 }
  0x39   :  { %630 = shalt.err (!%p627_p12)
}
  0x3a   :  { %s631_s1 = scalar_lea.vmem %s59_s17, 2048  ;;  %p636_p0 = scmp.lt.s32.totalorder %s59_s17, %s59_s17 }
  0x3b   :  { %p632_p13 = scmp.ne.s32.totalorder %s59_s17, %s631_s1  ;;  %p637_p1 = scmp.lt.s32.totalorder %s631_s1, %s631_s1 }
  0x3d   :  { %p638_p2 = por %p637_p1, %p636_p0 }
  0x3f   :  { %p639_p3 = pnand %p638_p2, %p632_p13 }
  0x41   :  { %642 = shalt.err (!%p639_p3)
}
  0x42   :  { %64 = dma.hbm_to_vmem [thread:$0]  %s793_s5, 2048, %s59_s17, [#allocation8], %s650_s11, %s650_s11, %s651_s12  }
  0x43   :  { %643 = dma.done.wait [#allocation3], 128  }
  0x44   :  { %644 = vsyncadd [#allocation3], 4294967168 }
  0x45   :  { %645 = dma.done.wait [#allocation5], 2304  }
  0x46   :  { %646 = vsyncadd [#allocation5], 4294964992 }
  0x47   :  { %647 = dma.done.wait [#allocation8], 2048  }
  0x48   :  { %648 = vsyncadd [#allocation8], 4294965248  ;;  %v655_v0 = vmov 0.0|0.0   ;;  %vm656_vm0 = vmmov 0   ;;  %v657_v1 = vmov 0.0   ;;  %v80_v2 = vld [vmem:[#allocation4] sm:$0xff] }
  0x49   :  { %489 = vmatprep.subr.bf16.mxu0 %v655_v0  ;;  %416 = vmatprep.mubr.msk.f32.mxu0 %vm656_vm0, %v657_v1  ;;  %v81_v3 = vld [vmem:[#allocation4 + $0x8] sm:$0xff]  ;;  %v164_v5 = vld [vmem:[#allocation6] sm:$0xff]  ;;  %v165_v6 = vld [vmem:[#allocation6 + $0x8] sm:$0xff]  ;;  %vm89_vm1 = vcmask 130048   ;;  %vm351_vm2 = vcmask 31744  }
  0x4a   :  { %492 = vmatprep.subr.bf16.mxu1 %v655_v0  ;;  %451 = vmatprep.mubr.msk.f32.mxu1 %vm656_vm0, %v657_v1  ;;  %v490_v4 = vpack.c.bf16 %v81_v3, %v80_v2  ;;  %v166_v7 = vld [vmem:[#allocation6 + $0x10] sm:$0xff]  ;;  %v493_v8 = vpack.c.bf16 %v165_v6, %v164_v5  ;;  %v167_v9 = vld [vmem:[#allocation6 + $0x18] sm:$0xff]  ;;  %v79_v10 = vld [vmem:[#allocation2] sm:$0xff]  ;;  %v658_v5 = vmov 4  }
  0x4b   :  { %v496_v11 = vpack.c.bf16 %v167_v9, %v166_v7  ;;  %v168_v12 = vld [vmem:[#allocation6 + $0x20] sm:$0xff]  ;;  %v169_v13 = vld [vmem:[#allocation6 + $0x28] sm:$0xff]  ;;  %v170_v15 = vld [vmem:[#allocation6 + $0x30] sm:$0xff]  ;;  %550 = vset.pattern.permute.xlu0 %v658_v5 }
  0x4c   :  { %491 = vmatpush3.bf16.msra.mxu0 %v490_v4  ;;  %494 = vmatpush3.bf16.msra.mxu1 %v493_v8  ;;  %v499_v14 = vpack.c.bf16 %v169_v13, %v168_v12  ;;  %v171_v16 = vld [vmem:[#allocation6 + $0x38] sm:$0xff]  ;;  %v172_v18 = vld [vmem:[#allocation6 + $0x40] sm:$0xff]  ;;  %v173_v19 = vld [vmem:[#allocation6 + $0x48] sm:$0xff] }
  0x4d   :  { %516 = vmatprep.subr.bf16.mxu0 %v655_v0  ;;  %495 = vmatprep.subr.bf16.mxu1 %v655_v0  ;;  %v502_v17 = vpack.c.bf16 %v171_v16, %v170_v15  ;;  %v505_v20 = vpack.c.bf16 %v173_v19, %v172_v18  ;;  %v174_v21 = vld [vmem:[#allocation6 + $0x50] sm:$0xff]  ;;  %v175_v22 = vld [vmem:[#allocation6 + $0x58] sm:$0xff]  ;;  %v176_v24 = vld [vmem:[#allocation6 + $0x60] sm:$0xff] }
  0x4e   :  { %v508_v23 = vpack.c.bf16 %v175_v22, %v174_v21  ;;  %v177_v25 = vld [vmem:[#allocation6 + $0x68] sm:$0xff]  ;;  %v178_v27 = vld [vmem:[#allocation6 + $0x70] sm:$0xff]  ;;  %v179_v28 = vld [vmem:[#allocation6 + $0x78] sm:$0xff] }
  0x4f   :  { %417 = vmatmul.mubr.msk.f32.vlgmr.msra.gmra.mrb[0].mxu0 %vm89_vm1, %v79_v10  ;;  %v511_v26 = vpack.c.bf16 %v177_v25, %v176_v24  ;;  %v514_v29 = vpack.c.bf16 %v179_v28, %v178_v27  ;;  %v258_v30 = vld [vmem:[#allocation7] sm:$0xff]  ;;  %v259_v31 = vld [vmem:[#allocation7 + $0x8] sm:$0xff]  ;;  %v260_v32 = vld [vmem:[#allocation7 + $0x10] sm:$0xff] }
  0x50   :  { %486 = vmatprep.mubr.msk.f32.mxu0 %vm656_vm0, %v657_v1  ;;  %497 = vmatpush3.bf16.msra.mxu1 %v496_v11  ;;  %v517_v33 = vpack.c.bf16 %v259_v31, %v258_v30  ;;  %v261_v34 = vld [vmem:[#allocation7 + $0x18] sm:$0xff]  ;;  %v262_v36 = vld [vmem:[#allocation7 + $0x20] sm:$0xff]  ;;  %v263_v37 = vld [vmem:[#allocation7 + $0x28] sm:$0xff] }
  0x51   :  { %498 = vmatprep.subr.bf16.mxu1 %v655_v0  ;;  %v520_v35 = vpack.c.bf16 %v261_v34, %v260_v32  ;;  %v523_v38 = vpack.c.bf16 %v263_v37, %v262_v36  ;;  %v264_v39 = vld [vmem:[#allocation7 + $0x30] sm:$0xff]  ;;  %v265_v40 = vld [vmem:[#allocation7 + $0x38] sm:$0xff]  ;;  %v266_v42 = vld [vmem:[#allocation7 + $0x40] sm:$0xff] }
  0x52   :  { %518 = vmatpush3.bf16.msra.mxu0 %v517_v33  ;;  %v526_v41 = vpack.c.bf16 %v265_v40, %v264_v39  ;;  %v267_v43 = vld [vmem:[#allocation7 + $0x48] sm:$0xff]  ;;  %v268_v50 = vld [vmem:[#allocation7 + $0x50] sm:$0xff]  ;;  %v269_v51 = vld [vmem:[#allocation7 + $0x58] sm:$0xff] }
  0x53   :  { %519 = vmatprep.subr.bf16.mxu0 %v655_v0  ;;  %v529_v44 = vpack.c.bf16 %v267_v43, %v266_v42  ;;  %v371_v45 = vld [vmem:[%s790_s2] ss:$0 sm:$0xff]  ;;  %v532_v52 = vpack.c.bf16 %v269_v51, %v268_v50  ;;  %v270_v53 = vld [vmem:[#allocation7 + $0x60] sm:$0xff]  ;;  %v272_v56 = vld [vmem:[#allocation7 + $0x70] sm:$0xff] }
  0x54   :  { %500 = vmatpush3.bf16.msra.mxu1 %v499_v14  ;;  %v271_v54 = vld [vmem:[#allocation7 + $0x68] sm:$0xff]  ;;  %v273_v57 = vld [vmem:[#allocation7 + $0x78] sm:$0xff] }
  0x55   :  { %501 = vmatprep.subr.bf16.mxu1 %v655_v0  ;;  %v535_v55 = vpack.c.bf16 %v271_v54, %v270_v53  ;;  %v538_v58 = vpack.c.bf16 %v273_v57, %v272_v56  ;;  %v373_v59 = vld [vmem:[%s792_s4] ss:$0 sm:$0xff] }
  0x56   :  { %521 = vmatpush3.bf16.msra.mxu0 %v520_v35  ;;  %v374_v1 = vld [vmem:[%s794_s6] ss:$0 sm:$0xff] }
  0x57   :  { %522 = vmatprep.subr.bf16.mxu0 %v655_v0 }
  0x58   :  { %503 = vmatpush3.bf16.msra.mxu1 %v502_v17 }
  0x59   :  { %504 = vmatprep.subr.bf16.mxu1 %v655_v0 }
  0x5a   :  { %524 = vmatpush3.bf16.msra.mxu0 %v523_v38 }
  0x5b   :  { %525 = vmatprep.subr.bf16.mxu0 %v655_v0 }
  0x5c   :  { %506 = vmatpush3.bf16.msra.mxu1 %v505_v20 }
  0x5d   :  { %507 = vmatprep.subr.bf16.mxu1 %v655_v0 }
  0x5e   :  { %527 = vmatpush3.bf16.msra.mxu0 %v526_v41 }
  0x5f   :  { %528 = vmatprep.subr.bf16.mxu0 %v655_v0 }
  0x60   :  { %509 = vmatpush3.bf16.msra.mxu1 %v508_v23 }
  0x61   :  { %510 = vmatprep.subr.bf16.mxu1 %v655_v0 }
  0x62   :  { %530 = vmatpush3.bf16.msra.mxu0 %v529_v44 }
  0x63   :  { %531 = vmatprep.subr.bf16.mxu0 %v655_v0 }
  0x64   :  { %512 = vmatpush3.bf16.msra.mxu1 %v511_v26 }
  0x65   :  { %513 = vmatprep.subr.bf16.mxu1 %v655_v0 }
  0x66   :  { %533 = vmatpush3.bf16.msra.mxu0 %v532_v52 }
  0x67   :  { %534 = vmatprep.subr.bf16.mxu0 %v655_v0 }
  0x68   :  { %515 = vmatpush3.bf16.msra.mxu1 %v514_v29 }
  0x6a   :  { %536 = vmatpush3.bf16.msra.mxu0 %v535_v55 }
  0x6b   :  { %537 = vmatprep.subr.bf16.mxu0 %v655_v0 }
  0x6e   :  { %539 = vmatpush3.bf16.msra.mxu0 %v538_v58 }
 0x122   :  { %v159_v46 = vpop.f32.mrb[0].mxu0 }
 0x123   :  { %v160_v47 = vadd.f32 %v371_v45, %v159_v46  ;;  %v418_v48 = vpop.f32.mrb[1].mxu0 }
 0x125   :  { %551 = vtanh.f32 %v160_v47 }
 0x12f   :  { %v552_v49 = vpop.eup %551 }
 0x130   :  { %452 = vmatmul.mubr.f32.vlgmr.msra.gmra.mrb[0].mxu1 %v552_v49 }
 0x203   :  { %v253_v60 = vpop.f32.mrb[0].mxu1 }
 0x204   :  { %v254_v61 = vadd.f32 %v373_v59, %v253_v60  ;;  %v453_v62 = vpop.f32.mrb[1].mxu1 }
 0x206   :  { %553 = vtanh.f32 %v254_v61 }
 0x210   :  { %v554_v63 = vpop.eup %553 }
 0x211   :  { %487 = vmatmul.mubr.f32.vlgmr.msra.gmra.mrb[2].mxu0 %v554_v63 }
 0x2e4   :  { %v347_v2 = vpop.f32.mrb[2].mxu0 }
 0x2e5   :  { %v348_v3 = vadd.f32 %v374_v1, %v347_v2  ;;  %v488_v4 = vpop.f32.mrb[3].mxu0 }
 0x2e7   :  { %v352_v0 = vsel %vm351_vm2, %v348_v3, 0.0 }
 0x2e8   :  { %353 = vadd.xlane.f32.xlu0 %v352_v0 }
 0x375   :  { %v354_v6 = vpop.xlane.xlu0 %353 }
 0x376   :  { %v355_v7 = vmul.f32 0.25, %v354_v6 }
 0x378   :  { %v356_v8 = vsub.f32 %v348_v3, %v355_v7 }
 0x37a   :  { %359 = vperm.xlu0 %550, %v356_v8  }
 0x3f9   :  { %v360_v9 = vpop.permute.xlu0 %359 }
 0x3fa   :  { %v362_v10 = vadd.f32 %v360_v9, %v348_v3 }
 0x3fc   :  { %363 = vst.msk [vmem:[%s795_s7] sm:$0xff] %vm351_vm2, %v362_v10 }
 0x3fd   :  { %368 = vsyncpa [#allocation3], 1 }
 0x3fe   :  { %369 = vsyncpa [#allocation5], 1 }
 0x3ff   :  { %370 = vsyncpa [#allocation8], 1 }

</bundles_post_ra>
